<compile_context>
chip_gen: v7x
topology: tpu7x:2x2x1
jax: 0.10.0
libtpu: 0.0.40
codegen_flags: <defaults>
</compile_context>

<pallas_src>
import jax
import jax.numpy as jnp
from jax.experimental import pallas as pl
from jax.experimental.pallas import tpu as pltpu


def _round_up(x, m):
    return ((x + m - 1) // m) * m


def offsetnet_kernel(xT_ref, wT_ref, c_ref, o_ref):
    """Collapsed forward: clip(W^T @ x^T + b, cmin, cmax), transposed so the
    batch axis is the lane-dense last dim of both the load and the store."""
    y = jnp.dot(wT_ref[...], xT_ref[...], preferred_element_type=jnp.float32)
    y = y + c_ref[:, 0:1]                                      # folded bias
    o_ref[...] = jnp.clip(y, c_ref[:, 1:2], c_ref[:, 2:3])     # clip_values min/max


def offsetnet_forward(x, params, tile_n=1024):
    """x: (N, P, 2) float32; returns (N, out_channels) float32."""
    n, p, two = x.shape
    assert two == 2
    in_ch = 2 * p
    x_flat = x.reshape(n, in_ch).astype(jnp.float32)

    w1 = params["w1"].astype(jnp.float32)          # (in_ch, base)
    b1 = params["b1"].astype(jnp.float32)          # (base,)
    w2 = params["w2"].astype(jnp.float32)          # (base, out)
    b2 = params["b2"].astype(jnp.float32)          # (out,)
    out_ch = w2.shape[1]
    # The module's forward broadcast of clip_values rows only type-checks for
    # out_channels == 2; clip_values laid out (2, out): row 0 = min, row 1 = max.
    assert out_ch == 2

    # ---- constant folding (param-prep time, outside the kernel) -----------------
    # minmax-constant norm:  xn = a*x + c  with  a = 2/(mx-mn), c = -2*mn/(mx-mn) - 1
    mn = jnp.broadcast_to(params["_min"].astype(jnp.float32), (1, p, 2)).reshape(in_ch)
    mx = jnp.broadcast_to(params["_max"].astype(jnp.float32), (1, p, 2)).reshape(in_ch)
    a = 2.0 / (mx - mn)
    c = -2.0 * mn / (mx - mn) - 1.0
    # depth==0 net = Linear(in, base) . Linear(base, out), no activation -> collapse
    Wc = w1 @ w2                                   # (in_ch, out_ch)
    bc = b1 @ w2 + b2                              # (out_ch,)
    W_fold = a[:, None] * Wc                       # absorb the normalization
    b_fold = c @ Wc + bc
    # znorm renorm:  y * z_values[1] + z_values[0]
    zshift = params["z_values"][0].astype(jnp.float32)
    zscale = params["z_values"][1].astype(jnp.float32)
    W_final = W_fold * zscale[None, :]
    b_final = b_fold * zscale + zshift
    cmin = params["clip_values"][0].astype(jnp.float32)
    cmax = params["clip_values"][1].astype(jnp.float32)

    # ---- pack / pad for lane-dense, sublane-aligned kernel layout ---------------
    out_pad = _round_up(out_ch, 8)                       # sublane-align the tiny out dim
    wT = jnp.zeros((out_pad, in_ch), jnp.float32).at[:out_ch, :].set(W_final.T)
    consts = jnp.zeros((out_pad, 3), jnp.float32)
    consts = consts.at[:out_ch, 0].set(b_final)
    consts = consts.at[:out_ch, 1].set(cmin)
    consts = consts.at[:out_ch, 2].set(cmax)

    tile_n = min(tile_n, _round_up(n, 128))              # lane-dense batch tiles (>=128)
    n_pad = _round_up(n, tile_n)
    xT = jnp.zeros((in_ch, n_pad), jnp.float32).at[:, :n].set(x_flat.T)

    grid = (n_pad // tile_n,)
    out_t = pl.pallas_call(
        offsetnet_kernel,
        out_shape=jax.ShapeDtypeStruct((out_pad, n_pad), jnp.float32),
        grid=grid,
        in_specs=[
            pl.BlockSpec((in_ch, tile_n), lambda i: (0, i)),    # x^T, tiled over batch
            pl.BlockSpec((out_pad, in_ch), lambda i: (0, 0)),   # W^T, VMEM-resident
            pl.BlockSpec((out_pad, 3), lambda i: (0, 0)),       # bias/cmin/cmax packed
        ],
        out_specs=pl.BlockSpec((out_pad, tile_n), lambda i: (0, i)),
        compiler_params=pltpu.CompilerParams(
            dimension_semantics=("parallel",)),                 # shard batch across TCs (v7x)
    )(xT, wT, consts)
    return out_t[:out_ch, :n].T


def offsetnet_reference(x, params):
    """Pure-JAX replica of the PyTorch forward (un-folded), for validation."""
    xn = ((x - params["_min"]) / (params["_max"] - params["_min"]) - 0.5) * 2.0
    xf = xn.reshape(x.shape[0], -1)
    y = xf @ params["w1"] + params["b1"]
    y = y @ params["w2"] + params["b2"]
    y = y * params["z_values"][1] + params["z_values"][0]
    return jnp.clip(y, params["clip_values"][0], params["clip_values"][1])


if __name__ == "__main__":
    N, P = 8, 16                 # batch, number of landmark points
    in_channels = 2 * P          # 32
    base_channels = 128
    out_channels = 2

    key = jax.random.PRNGKey(0)
    k_x, k_w1, k_b1, k_w2, k_b2 = jax.random.split(key, 5)

    x = jax.random.uniform(k_x, (N, P, 2), jnp.float32, minval=-2.0, maxval=2.0)

    # torch.nn.Linear-style deterministic init (uniform(-1/sqrt(fan_in), 1/sqrt(fan_in)))
    lim1 = 1.0 / float(in_channels) ** 0.5
    lim2 = 1.0 / float(base_channels) ** 0.5
    params = {
        "w1": jax.random.uniform(k_w1, (in_channels, base_channels), jnp.float32, -lim1, lim1),
        "b1": jax.random.uniform(k_b1, (base_channels,), jnp.float32, -lim1, lim1),
        "w2": jax.random.uniform(k_w2, (base_channels, out_channels), jnp.float32, -lim2, lim2),
        "b2": jax.random.uniform(k_b2, (out_channels,), jnp.float32, -lim2, lim2),
        # buffers (deterministic, non-degenerate)
        "_min": jnp.array([[[-2.0, -3.0]]], jnp.float32),            # (1, 1, 2)
        "_max": jnp.array([[[2.0, 3.0]]], jnp.float32),              # (1, 1, 2)
        "z_values": jnp.array([[0.1, -0.2],                          # shift (row 0)
                               [1.5, 0.75]], jnp.float32),           # scale (row 1), (2, out)
        "clip_values": jnp.array([[-1.0, -0.8],                      # min  (row 0)
                                  [1.0, 0.8]], jnp.float32),         # max  (row 1), (2, out)
    }

    out = offsetnet_forward(x, params)
    out = jax.block_until_ready(out)

    ref = offsetnet_reference(x, params)
    assert out.shape == (N, out_channels)
    # Constant-folding reassociates the f32 arithmetic; allow a few ULPs of slack.
    assert jnp.allclose(out, ref, rtol=1e-5, atol=2e-5), "Pallas kernel mismatch vs JAX reference"

    print("KERNEL_OK")
</pallas_src>

<mosaic_0001>
module attributes {stable_mosaic.version = 11 : i64} {
  func.func @offsetnet_kernel(%arg0: i32, %arg1: memref<32x128xf32, #tpu.memory_space<vmem>>, %arg2: memref<8x32xf32, #tpu.memory_space<vmem>>, %arg3: memref<8x3xf32, #tpu.memory_space<vmem>>, %arg4: memref<8x128xf32, #tpu.memory_space<vmem>>) attributes {dimension_semantics = [#tpu.dimension_semantics<parallel>], iteration_bounds = array<i64: 1>, scalar_prefetch = 0 : i64, scratch_operands = 0 : i64, tpu.core_type = #tpu.core_type<tc>, window_params = [{transform_indices = @transform_0, window_bounds = array<i64: 32, 128>}, {pipeline_mode = #tpu.pipeline_mode<synchronous>, transform_indices = @transform_1, window_bounds = array<i64: 8, 32>}, {pipeline_mode = #tpu.pipeline_mode<synchronous>, transform_indices = @transform_2, window_bounds = array<i64: 8, 3>}, {transform_indices = @transform_3, window_bounds = array<i64: 8, 128>}]} {
    %c0 = arith.constant 0 : index
    %c0_0 = arith.constant 0 : index
    %0 = vector.load %arg2[%c0, %c0_0] : memref<8x32xf32, #tpu.memory_space<vmem>>, vector<8x32xf32>
    %c0_1 = arith.constant 0 : index
    %c0_2 = arith.constant 0 : index
    %1 = vector.load %arg1[%c0_1, %c0_2] : memref<32x128xf32, #tpu.memory_space<vmem>>, vector<32x128xf32>
    %cst = arith.constant dense<0.000000e+00> : vector<8x128xf32>
    %2 = tpu.matmul %0, %1, %cst {dimension_numbers = #tpu.dot_dimension_numbers<[1], [0], [0], [1], [0, 0, 1, 1], [], []>} : vector<8x32xf32>, vector<32x128xf32>, vector<8x128xf32> -> vector<8x128xf32>
    %c0_3 = arith.constant 0 : index
    %c0_4 = arith.constant 0 : index
    %3 = vector.load %arg3[%c0_3, %c0_4] : memref<8x3xf32, #tpu.memory_space<vmem>>, vector<8x1xf32>
    %4 = vector.broadcast %3 : vector<8x1xf32> to vector<8x128xf32>
    %5 = arith.addf %2, %4 : vector<8x128xf32>
    %c0_5 = arith.constant 0 : index
    %c1 = arith.constant 1 : index
    %6 = vector.load %arg3[%c0_5, %c1] : memref<8x3xf32, #tpu.memory_space<vmem>>, vector<8x1xf32>
    %c0_6 = arith.constant 0 : index
    %c2 = arith.constant 2 : index
    %7 = vector.load %arg3[%c0_6, %c2] : memref<8x3xf32, #tpu.memory_space<vmem>>, vector<8x1xf32>
    %8 = vector.broadcast %6 : vector<8x1xf32> to vector<8x128xf32>
    %9 = arith.maximumf %8, %5 : vector<8x128xf32>
    %10 = vector.broadcast %7 : vector<8x1xf32> to vector<8x128xf32>
    %11 = arith.minimumf %10, %9 : vector<8x128xf32>
    %c0_7 = arith.constant 0 : index
    %c0_8 = arith.constant 0 : index
    %12 = vector.load %arg4[%c0_7, %c0_8] : memref<8x128xf32, #tpu.memory_space<vmem>>, vector<8x128xf32>
    tpu.vector_store %arg4[%c0_7, %c0_8], %11 {strides = array<i32>} : memref<8x128xf32, #tpu.memory_space<vmem>>, vector<8x128xf32>,
    return
  }
  func.func @transform_0(%arg0: i32) -> (i32, i32) {
    %c0_i32 = arith.constant 0 : i32
    %c0_i32_0 = arith.constant 0 : i32
    return %c0_i32, %arg0 : i32, i32
  }
  func.func @transform_1(%arg0: i32) -> (i32, i32) {
    %c0_i32 = arith.constant 0 : i32
    %c0_i32_0 = arith.constant 0 : i32
    %c0_i32_1 = arith.constant 0 : i32
    return %c0_i32, %c0_i32_0 : i32, i32
  }
  func.func @transform_2(%arg0: i32) -> (i32, i32) {
    %c0_i32 = arith.constant 0 : i32
    %c0_i32_0 = arith.constant 0 : i32
    %c0_i32_1 = arith.constant 0 : i32
    return %c0_i32, %c0_i32_0 : i32, i32
  }
  func.func @transform_3(%arg0: i32) -> (i32, i32) {
    %c0_i32 = arith.constant 0 : i32
    %c0_i32_0 = arith.constant 0 : i32
    return %c0_i32, %arg0 : i32, i32
  }
}

</mosaic_0001>

<bundles_post_ra>
// kernel: tpu_custom_call.1
= control target key start
LH: loop header
LB: loop body
LE: loop exit
PB: predicated region body
PF: predicated region fallthrough
CT: control target
= control target key end

     0   :  { %8 = vsyncpa [#allocation3], 0  ;;  %s285_s0 = inlined_call_operand.hbm [shape: f32[32,128], index: 0, kind: input, shape index: {}]   ;;  %s286_s1 = inlined_call_operand.vmem [shape: f32[8,32], index: 1, kind: input, shape index: {}]   ;;  %s287_s2 = inlined_call_operand.vmem [shape: f32[8,3], index: 2, kind: input, shape index: {}]   ;;  %s288_s3 = inlined_call_operand.hbm [shape: f32[8,128], index: 3, kind: output, shape index: {}]  }
   0x1   :  { %9 = vsyncpa [#allocation4], 0  ;;  %s225_s12 = smov [#allocation2]   ;;  %s177_s16 = scalar_lea.hbm %s285_s0, 512 }
   0x2   :  { %s15_s13 = sshll.u32 %s225_s12, 4  ;;  %p178_p0 = scmp.ne.s32.totalorder %s285_s0, %s177_s16  ;;  %s16_s13 = int_to_ptr.vmem [resolvable:$true] %s15_s13 }
   0x3   :  { %p181_p1 = scmp.lt.u32.totalorder %s177_s16, %s285_s0 }
   0x5   :  { %p183_p2 = pnand %p181_p1, %p178_p0 }
   0x7   :  { %186 = shalt.err (!%p183_p2)
}
   0x8   :  { %s187_s21 = scalar_lea.vmem %s16_s13, 512  ;;  %p192_p4 = scmp.lt.s32.totalorder %s16_s13, %s16_s13 }
   0x9   :  { %p188_p3 = scmp.ne.s32.totalorder %s16_s13, %s187_s21  ;;  %p193_p5 = scmp.lt.s32.totalorder %s187_s21, %s187_s21 }
   0xb   :  { %p194_p6 = por %p193_p5, %p192_p4 }
   0xd   :  { %p195_p7 = pnand %p194_p6, %p188_p3 }
   0xf   :  { %198 = shalt.err (!%p195_p7)
}
  0x10   :  { %s226_s22 = smov 128   ;;  %s227_s23 = smov 8  }
  0x11   :  { %21 = dma.hbm_to_vmem [thread:$0]  %s285_s0, 512, %s16_s13, [#allocation3], %s226_s22, %s226_s22, %s227_s23  }
  0x12   :  { %221 = dma.done.wait [#allocation3], 512  }
  0x13   :  { %222 = vsyncadd [#allocation3], 4294966784  ;;  %v228_v0 = vmov 0.0|0.0   ;;  %vm229_vm0 = vmmov 0   ;;  %v230_v1 = vmov 0.0   ;;  %v231_v2 = vmov 0  }
  0x14   :  { %157 = vmatprep.subr.bf16.mxu0 %v228_v0  ;;  %154 = vmatprep.mubr.msk.f32.mxu0 %vm229_vm0, %v230_v1  ;;  %v232_v3 = vmov 2   ;;  %v30_v4 = vld [vmem:[#allocation2] sm:$0xff]  ;;  %v31_v5 = vld [vmem:[#allocation2 + $0x8] sm:$0xff]  ;;  %v32_v6 = vld [vmem:[#allocation2 + $0x10] sm:$0xff]  ;;  %v233_v11 = vmov 1   ;;  %vm40_vm1 = vcmask 261120  }
  0x15   :  { %173 = vset.pattern.permute.xlu0 %v231_v2  ;;  %175 = vset.pattern.permute.xlu1 %v232_v3  ;;  %v158_v7 = vpack.c.bf16 %v31_v5, %v30_v4  ;;  %v33_v8 = vld [vmem:[#allocation2 + $0x18] sm:$0xff]  ;;  %v34_v9 = vld [vmem:[%s287_s2] sm:$0xff]  ;;  %s234_s2 = smov [#allocation5]  }
  0x16   :  { %37 = vperm.xlu0 %173, %v34_v9   ;;  %120 = vperm.xlu1 %175, %v34_v9   ;;  %v161_v10 = vpack.c.bf16 %v33_v8, %v32_v6  ;;  %v29_v12 = vld [vmem:[%s286_s1] sm:$0xff]  ;;  %s131_s29 = sshll.u32 %s234_s2, 4  ;;  %s132_s29 = int_to_ptr.vmem [resolvable:$true] %s131_s29 }
  0x17   :  { %159 = vmatpush3.bf16.msra.mxu0 %v158_v7  ;;  %s199_s30 = scalar_lea.vmem %s132_s29, 128  ;;  %p204_p9 = scmp.lt.s32.totalorder %s132_s29, %s132_s29 }
  0x18   :  { %160 = vmatprep.subr.bf16.mxu0 %v228_v0  ;;  %p200_p8 = scmp.ne.s32.totalorder %s132_s29, %s199_s30  ;;  %p205_p10 = scmp.lt.s32.totalorder %s199_s30, %s199_s30 }
  0x1a   :  { %174 = vset.pattern.permute.xlu0 %v233_v11  ;;  %p206_p11 = por %p205_p10, %p204_p9 }
  0x1b   :  { %162 = vmatpush3.bf16.msra.mxu0 %v161_v10  ;;  %115 = vperm.xlu0 %174, %v34_v9  }
  0x1c   :  { %p207_p12 = pnand %p206_p11, %p200_p8 }
  0x1e   :  { %155 = vmatmul.mubr.msk.f32.vlgmr.msra.gmra.mrb[0].mxu0 %vm40_vm1, %v29_v12 }
  0x1f   :  { %176 = vset.pattern.permute.xlu0 %v232_v3 }
  0x95   :  { %v38_v13 = vpop.permute.xlu0 %37  ;;  %v121_v18 = vpop.permute.xlu1 %120 }
  0x9a   :  { %v116_v15 = vpop.permute.xlu0 %115 }
  0xf1   :  { %v110_v14 = vpop.f32.mrb[0].mxu0 }
  0xf2   :  { %v111_v16 = vadd.f32 %v110_v14, %v38_v13  ;;  %v156_v17 = vpop.f32.mrb[1].mxu0 }
  0xf4   :  { %v118_v19 = vmax.f32 %v116_v15, %v111_v16 }
  0xf6   :  { %v123_v20 = vmin.f32 %v121_v18, %v118_v19 }
  0xf8   :  { %124 = vst [vmem:[#allocation5] sm:$0xff] %v123_v20 }
  0xf9   :  { %210 = shalt.err (!%p207_p12)
}
  0xfa   :  { %s211_s5 = scalar_lea.hbm %s288_s3, 128 }
  0xfb   :  { %p212_p13 = scmp.ne.s32.totalorder %s288_s3, %s211_s5  ;;  %p215_p0 = scmp.lt.u32.totalorder %s211_s5, %s288_s3 }
  0xfd   :  { %p217_p1 = pnand %p215_p0, %p212_p13 }
  0xff   :  { %220 = shalt.err (!%p217_p1)
}
 0x100   :  { %134 = dma.vmem_to_hbm [thread:$0]  %s132_s29, 128, %s288_s3, [#allocation4]  }
 0x101   :  { %223 = dma.done.wait [#allocation4], 128  }
 0x102   :  { %224 = vsyncadd [#allocation4], 4294967168 }
 0x103   :  { %138 = vsyncpa [#allocation3], 1 }
 0x104   :  { %139 = vsyncpa [#allocation4], 1 }

</bundles_post_ra>
